<compile_context>
chip_gen: v7x
topology: tpu7x:2x2x1
jax: 0.10.0
libtpu: 0.0.40
codegen_flags: <defaults>
</compile_context>

<pallas_src>
import jax
import jax.numpy as jnp
from jax.experimental import pallas as pl
from jax.experimental.pallas import tpu as pltpu


def _permute_kernel(x_ref, o_ref):
    # x_ref: (Bt, C, Ht, W) tile in VMEM   (NCHW slab)
    # o_ref: (Bt, Ht, W*C) tile in VMEM    (lane-dense NHWC slab, W and C merged)
    bt, c, ht, w = x_ref.shape
    x = x_ref[...]
    y = jnp.transpose(x, (0, 2, 3, 1))          # (Bt, Ht, W, C)
    o_ref[...] = y.reshape(bt, ht, w * c)       # trailing-dim merge -> lane-dense store


def _largest_divisor(n, cap, multiple_of=1):
    """Largest divisor of n that is <= cap and a multiple of `multiple_of`."""
    best = None
    for d in range(1, n + 1):
        if n % d == 0 and d <= cap and d % multiple_of == 0:
            best = d
    return best


def permute_nchw_to_nhwc(x: jax.Array, *, target_block_bytes: int = 4 * 1024 * 1024) -> jax.Array:
    """Pallas equivalent of Permute(0, 2, 3, 1) applied to an NCHW tensor."""
    B, C, H, W = x.shape
    bpe = jnp.dtype(x.dtype).itemsize
    slab_bytes = C * H * W * bpe          # one batch element, full spatial extent

    # ---- choose tiling (batch tiles x H tiles), ~<= target_block_bytes per buffer ----
    if slab_bytes <= target_block_bytes:
        # Small per-batch slab: block several batch elements per grid step.
        ht = H
        bt = _largest_divisor(B, max(1, target_block_bytes // slab_bytes)) or 1
        if bt == B and B >= 2:
            # Keep >= 2 grid steps so the "parallel" axis can shard across cores.
            bt = _largest_divisor(B, B // 2) or 1
    else:
        # Large per-batch slab: one batch element per step, tile H.
        bt = 1
        sublane = {4: 8, 2: 16, 1: 32}.get(bpe, 8)   # second-minor alignment per dtype
        max_ht = max(1, target_block_bytes // (C * W * bpe))
        ht = _largest_divisor(H, max_ht, multiple_of=sublane)
        if ht is None:
            ht = H  # cannot tile H cleanly -> fall back to the full slab

    grid = (B // bt, H // ht)
    block_bytes = bt * C * ht * W * bpe
    # in + out, double-buffered, plus some slack; safe on v5e/v6e/v7x.
    vmem_limit = min(max(32 << 20, 4 * block_bytes + (4 << 20)), 64 << 20)

    # Lane-dense output: last dim is W*C (reshaped back to (W, C) in the wrapper).
    out_shape = jax.ShapeDtypeStruct((B, H, W * C), x.dtype)

    y2d = pl.pallas_call(
        _permute_kernel,
        out_shape=out_shape,
        grid_spec=pltpu.PrefetchScalarGridSpec(
            num_scalar_prefetch=0,
            grid=grid,
            in_specs=[
                # (Bt, C, Ht, W): last two dims are either full extents or
                # (multiple-of-sublane, full W), satisfying the (8,128) rule.
                pl.BlockSpec((bt, C, ht, W), lambda b, h: (b, 0, h, 0)),
            ],
            # (Bt, Ht, W*C): lane dim W*C equals the full output minor dim.
            out_specs=pl.BlockSpec((bt, ht, W * C), lambda b, h: (b, h, 0)),
        ),
        compiler_params=pltpu.CompilerParams(
            dimension_semantics=("parallel", "parallel"),
            vmem_limit_bytes=vmem_limit,
        ),
    )(x)

    # Free trailing-dim split (row-major contiguous), no axis reordering.
    return y2d.reshape(B, H, W, C)


if __name__ == "__main__":
    key = jax.random.PRNGKey(0)
    # Small NCHW input: batch=2, channels=4, spatial=16x16
    x = jax.random.normal(key, (2, 4, 16, 16), dtype=jnp.float32)

    y = permute_nchw_to_nhwc(x)
    y = jax.block_until_ready(y)

    # Correctness check against plain JAX permute (same semantics as
    # torch.Tensor.permute(0, 2, 3, 1)).
    y_ref = jnp.transpose(x, (0, 2, 3, 1))
    assert y.shape == (2, 16, 16, 4), y.shape
    assert y.dtype == x.dtype
    assert jnp.array_equal(y, y_ref), "Pallas permute does not match reference"

    print("KERNEL_OK")
</pallas_src>

<mosaic_0001>
module attributes {stable_mosaic.version = 11 : i64} {
  func.func @_permute_kernel(%arg0: i32, %arg1: i32, %arg2: memref<1x4x16x16xf32, #tpu.memory_space<vmem>>, %arg3: memref<1x16x64xf32, #tpu.memory_space<vmem>>) attributes {dimension_semantics = [#tpu.dimension_semantics<parallel>, #tpu.dimension_semantics<parallel>], iteration_bounds = array<i64: 2, 1>, scalar_prefetch = 0 : i64, scratch_operands = 0 : i64, tpu.core_type = #tpu.core_type<tc>, window_params = [{transform_indices = @transform_0, window_bounds = array<i64: 1, 4, 16, 16>}, {transform_indices = @transform_1, window_bounds = array<i64: 1, 16, 64>}]} {
    %c0 = arith.constant 0 : index
    %c0_0 = arith.constant 0 : index
    %c0_1 = arith.constant 0 : index
    %c0_2 = arith.constant 0 : index
    %0 = vector.load %arg2[%c0, %c0_0, %c0_1, %c0_2] : memref<1x4x16x16xf32, #tpu.memory_space<vmem>>, vector<1x4x16x16xf32>
    %1 = tpu.transpose %0, [0, 2, 3, 1] : vector<1x4x16x16xf32> -> vector<1x16x16x4xf32>
    %2 = vector.shape_cast %1 : vector<1x16x16x4xf32> to vector<1x16x64xf32>
    %c0_3 = arith.constant 0 : index
    %c0_4 = arith.constant 0 : index
    %c0_5 = arith.constant 0 : index
    %3 = vector.load %arg3[%c0_3, %c0_4, %c0_5] : memref<1x16x64xf32, #tpu.memory_space<vmem>>, vector<1x16x64xf32>
    tpu.vector_store %arg3[%c0_3, %c0_4, %c0_5], %2 {strides = array<i32>} : memref<1x16x64xf32, #tpu.memory_space<vmem>>, vector<1x16x64xf32>,
    return
  }
  func.func @transform_0(%arg0: i32, %arg1: i32) -> (i32, i32, i32, i32) {
    %c0_i32 = arith.constant 0 : i32
    %c0_i32_0 = arith.constant 0 : i32
    %c0_i32_1 = arith.constant 0 : i32
    return %arg0, %c0_i32, %arg1, %c0_i32_0 : i32, i32, i32, i32
  }
  func.func @transform_1(%arg0: i32, %arg1: i32) -> (i32, i32, i32) {
    %c0_i32 = arith.constant 0 : i32
    %c0_i32_0 = arith.constant 0 : i32
    return %arg0, %arg1, %c0_i32 : i32, i32, i32
  }
}

</mosaic_0001>

<bundles_post_ra>
// kernel: tpu_custom_call.1
= control target key start
LH: loop header
LB: loop body
LE: loop exit
PB: predicated region body
PF: predicated region fallthrough
CT: control target
= control target key end

     0   :  { %6 = vsyncpa [#allocation3], 0  ;;  %s3049_s0 = inlined_call_operand.hbm [shape: f32[2,4,16,16], index: 0, kind: input, shape index: {}]   ;;  %s3050_s1 = inlined_call_operand.hbm [shape: f32[2,16,64], index: 1, kind: output, shape index: {}]  }
   0x1   :  { %8 = vsyncpa [#allocation3 + $0x1], 0 }
   0x2   :  { %9 = vsyncpa [#allocation4], 0 }
   0x3   :  { %11 = vsyncpa [#allocation4 + $0x1], 0  ;;  %s2577_s6 = smov 0   ;;  %s2579_s7 = smov 0  }
   0x4   :  { %s2581_s8 = smov 0   ;;  %s2583_s9 = smov 0  }
   0x5   :  { %s2585_s10 = smov 0   ;;  %s2587_s11 = smov 0  }
   0x6 LB: > { %s2298_s12 = sadd.s32 4294967295, %s2542_s11   ;;  %s2299_s13 = sadd.s32 4294967294, %s2542_s11   ;;  %s2542_s11 = sphi %s2587_s11, %s17_s11   ;;  %s2538_s10 = sphi %s2585_s10, %s3065_s10   ;;  %s2534_s9 = sphi %s2583_s9, %s3064_s9   ;;  %s2530_s8 = sphi %s2581_s8, %s3063_s8   ;;  %s2526_s7 = sphi %s2579_s7, %s3062_s7   ;;  %s2522_s6 = sphi %s2577_s6, %s3061_s6  }
   0x7   : > { %s29_s14 = sadd.s32 1, %s2538_s10  ;;  %s38_s15 = sadd.s32 1, %s2530_s8 }
   0x8   : > { %p31_p0 = scmp.ge.s32.totalorder %s29_s14, 2  ;;  %p45_p1 = scmp.ne.s32.totalorder %s2530_s8, %s2526_s7 }
   0x9   : > { %p46_p2 = scmp.eq.s32.totalorder %s2542_s11, 0  ;;  %p51_p3 = scmp.ne.s32.totalorder %s2526_s7, %s2522_s6 }
   0xa   : > { %s3067_s14 = smov (%p31_p0, %s29_s14), 0  ;;  %p52_p5 = scmp.eq.s32.totalorder %s2298_s12, 0 }
   0xb   : > { %p2618_p4 = por %p46_p2, %p45_p1  ;;  %s33_s17 = ssub.s32 %s2538_s10, %s3067_s14 }
   0xc   : > { %p77_p6 = scmp.eq.s32.totalorder %s2298_s12, 1  ;;  %p36_p7 = scmp.eq.s32.totalorder %s33_s17, 0 }
   0xd   : > { %p2624_p8 = por %p52_p5, %p51_p3  ;;  %p83_p10 = scmp.eq.s32.totalorder %s2299_s13, 1 }
   0xe   : > { %p2628_p9 = por %p77_p6, %p45_p1  ;;  %p2359_p13 = scmp.lt.s32.totalorder %s2542_s11, 2 }
   0xf   : > { %s2633_s20 = scalar_select %p36_p7, %s2530_s8, %s38_s15  }
  0x10   : > { %s3054_s19 = scalar_select %p2628_p9, 1, 0 }
  0x11   : > { %p2635_p11 = por %p83_p10, %p51_p3  ;;  %s103_s22 = sand.u32 1, %s2530_s8  }
  0x12   : > { %s2302_s23 = sshll.u32 %s103_s22, 6  ;;  %s2345_s24 = sshll.u32 %s2538_s10, 10 }
  0x13   : > { %s3055_s21 = scalar_select %p2635_p11, 1, 0 }
  0x14   : > { %s2646_s27 = scalar_lea.hbm %s3049_s0, %s2345_s24  ;;  %s107_s28 = scalar_lea.vmem [#allocation2], %s2302_s23 }
  0x15   : > { %s116_s29 = sshll.u32 %s107_s28, 4  ;;  %p2652_p0 = pnand %p2359_p13, %p2618_p4  ;;  %s2648_s29 = int_to_ptr.vmem [resolvable:$true] %s116_s29 }
  0x16   : > { %s2657_s2 = scalar_lea.sflag [#allocation3], %s103_s22  ;;  %s2430_s3 = scalar_lea.hbm %s2646_s27, 1024 }
  0x17   : > { %p2431_p2 = scmp.ne.s32.totalorder %s2646_s27, %s2430_s3  ;;  %p2432_p3 = pneg %p2652_p0 }
  0x18   : > { %s2435_s12 = scalar_lea.hbm %s3049_s0, 2048  ;;  %p2436_p4 = scmp.lt.u32.totalorder %s2646_s27, %s3049_s0 }
  0x19   : > { %p2433_p5 = pnand %p2432_p3, %p2431_p2  ;;  %p2437_p7 = scmp.lt.u32.totalorder %s2435_s12, %s2430_s3 }
  0x1a   : > { %p2439_p13 = scmp.lt.u32.totalorder %s2430_s3, %s2646_s27 }
  0x1b   : > { %p2434_p6 = pneg %p2433_p5  ;;  %p2438_p10 = por %p2437_p7, %p2436_p4 }
  0x1d   : > { %p2440_p12 = por %p2439_p13, %p2438_p10 }
  0x1f   : > { %p2441_p1 = pnand %p2440_p12, %p2434_p6 }
  0x21   : > { %2444 = shalt.err (!%p2441_p1)
}
  0x22   : > { %s2445_s16 = scalar_lea.vmem %s2648_s29, 1024  ;;  %s2544_s17 = smov [#allocation2]  }
  0x23   : > { %p2446_p2 = scmp.ne.s32.totalorder %s2648_s29, %s2445_s16  ;;  %s2450_s22 = sshll.u32 %s2544_s17, 4  ;;  %s2451_s22 = int_to_ptr.vmem [resolvable:$false] %s2450_s22 }
  0x24   : > { %s2452_s23 = scalar_lea.vmem %s2451_s22, 2048  ;;  %p2453_p9 = scmp.lt.s32.totalorder %s2648_s29, %s2451_s22 }
  0x25   : > { %p2448_p5 = pnand %p2446_p2, %p2432_p3  ;;  %p2454_p4 = scmp.lt.s32.totalorder %s2452_s23, %s2445_s16 }
  0x27   : > { %p2449_p11 = pneg %p2448_p5  ;;  %p2455_p7 = por %p2454_p4, %p2453_p9 }
  0x29   : > { %p2456_p10 = pnand %p2455_p7, %p2449_p11 }
  0x2b   : > { %2459 = shalt.err (!%p2456_p10)
}
  0x2c   : > { %s2545_s24 = smov 128   ;;  %s2546_s25 = smov 8  }
  0x2d   : > { %2354 = dma.hbm_to_vmem [thread:$0]  (!%p2652_p0), %s2646_s27, 1024, %s2648_s29, %s2657_s2, %s2545_s24, %s2545_s24, %s2546_s25  }
  0x2e   : > { %p124_p12 = scmp.lt.s32.totalorder %s2542_s11, 3  ;;  %p3057_p1 = scmp.ge.s32.totalorder %s2542_s11, 1 }
  0x30   : > { %p125_p3 = pnand %p3057_p1, %p124_p12 }
  0x31   : > { %s2689_s26 = sand.u32 (!%p125_p3), 1, %s2526_s7  }
  0x32   : > { %128 = sbr.rel (%p125_p3) target bundleno = 569 (0x239), region = 24  ;;  %s2306_s28 = sshll.u32 (!%p125_p3), %s2689_s26, 6 }
  0x33   : > { %s131_s3 = scalar_lea.sflag (!%p125_p3), [#allocation3], %s2689_s26  ;;  %s134_s4 = scalar_lea.vmem (!%p125_p3), [#allocation2], %s2306_s28 }
  0x39   : > { %2513 = dma.done.wait (%p2624_p8), %s131_s3, 1024  }
  0x3a   : > { %2515 = vsyncadd (%p2624_p8), %s131_s3, 4294966272  ;;  %v157_v0 = vld [vmem:[%s134_s4 + $0x10] sm:$0xff]  ;;  %v155_v1 = vld [vmem:[%s134_s4] sm:$0xff]  ;;  %v2547_v8 = vmov 1983009808   ;;  %v296_v10 = vlaneseq  ;;  %v2549_v35 = vmov 0.0  }
  0x3b   : > { %195 = vxpose.xlu1.b32.start [1/2] (short) (narrow) %v157_v0, 16  ;;  %163 = vxpose.xlu0.b32.start [1/2] (short) (narrow) %v155_v1, 16  ;;  %v158_v2 = vld [vmem:[%s134_s4 + $0x18] sm:$0xff]  ;;  %v156_v3 = vld [vmem:[%s134_s4 + $0x8] sm:$0xff]  ;;  %v161_v4 = vld [vmem:[%s134_s4 + $0x30] sm:$0xff]  ;;  %v294_v9 = vunpack.c.l.s4 %v2547_v8  ;;  %s2550_s18 = smov 8  }
  0x3c   : > { %v159_v5 = vld [vmem:[%s134_s4 + $0x20] sm:$0xff]  ;;  %v162_v6 = vld [vmem:[%s134_s4 + $0x38] sm:$0xff]  ;;  %v160_v7 = vld [vmem:[%s134_s4 + $0x28] sm:$0xff]  ;;  %v297_v14 = vshrl.u32 %v296_v10, 7  ;;  %v2548_v17 = vmov 1934713408  }
  0x3d   : > { %v295_v13 = vunpack.c.0.s8 %v294_v9  ;;  %v326_v18 = vunpack.c.l.s4 %v2548_v17  ;;  %s2551_s27 = smov 4   ;;  %s2552_s29 = smov 12   ;;  %vm2147_vm0 = vcmask 31744   ;;  %vm2150_vm1 = vcmask 64512  }
  0x3e   : > { %s2553_s30 = smov 16   ;;  %s2554_s2 = smov 20   ;;  %vm2153_vm2 = vcmask 97280   ;;  %vm2156_vm3 = vcmask 130048   ;;  %vm2159_vm4 = vcmask 162816   ;;  %vm2162_vm5 = vcmask 195584  }
  0x3f   : > { %196 = vxpose.xlu1.b32.end [2/2] (short) (narrow) %v158_v2, 16  ;;  %164 = vxpose.xlu0.b32.end [2/2] (short) (narrow) %v156_v3, 16  ;;  %v2697_v19 = vsub.s32 %v295_v13, %v297_v14  ;;  %v327_v22 = vunpack.c.0.s8 %v326_v18  ;;  %s2555_s5 = smov 24   ;;  %s2556_s12 = smov 28   ;;  %vm2165_vm6 = vcmask 228352   ;;  %vm2168_vm7 = vcmask 261120  }
  0x40   : > { %s2557_s13 = smov 32   ;;  %s2558_s15 = smov 36   ;;  %vm2171_vm8 = vcmask 293888   ;;  %vm2174_vm9 = vcmask 326656   ;;  %vm2177_vm10 = vcmask 359424   ;;  %vm2180_vm11 = vcmask 392192  }
  0x41   : > { %v2701_v29 = vsub.s32 %v327_v22, %v297_v14  ;;  %s2559_s16 = smov 40   ;;  %s2560_s17 = smov 44   ;;  %vm2183_vm12 = vcmask 424960   ;;  %vm2186_vm13 = vcmask 457728   ;;  %vm2189_vm14 = vcmask 490496  }
  0x42   : > { %s2561_s22 = smov 48   ;;  %s2562_s23 = smov 52   ;;  %vm2192_vm15 = vcmask 523264  }
  0x43   : > { %259 = vxpose.xlu1.b32.start [1/2] (short) (narrow) %v161_v4, 16  ;;  %227 = vxpose.xlu0.b32.start [1/2] (short) (narrow) %v159_v5, 16  ;;  %s2563_s24 = smov 56   ;;  %s2564_s25 = smov 60  }
  0x44   : > { %s2307_s28 = sshll.u32 %s2689_s26, 4  ;;  %p3058_p9 = scmp.ne.s32.totalorder %s3054_s19, 0 }
  0x45   : > { %s152_s3 = scalar_lea.vmem [#allocation5], %s2307_s28 }
  0x46   : > { %s2211_s4 = sshll.u32 %s152_s3, 4  ;;  %s2991_s4 = int_to_ptr.vmem [resolvable:$true] %s2211_s4 }
  0x47   : > { %260 = vxpose.xlu1.b32.end [2/2] (short) (narrow) %v162_v6, 16  ;;  %228 = vxpose.xlu0.b32.end [2/2] (short) (narrow) %v160_v7, 16 }
  0xbb   : > { %v211_v11 = vpop.trf.xlu1  ;;  %v179_v12 = vpop.trf.xlu0 }
  0xbf   : > { %v212_v15 = vpop.trf.xlu1  ;;  %v180_v16 = vpop.trf.xlu0 }
  0xc3   : > { %v275_v20 = vpop.trf.xlu1  ;;  %v243_v21 = vpop.trf.xlu0 }
  0xc4   : > { %v307_v23 = vcombine.low %v211_v11, %v275_v20  ;;  %v291_v24 = vcombine.low %v179_v12, %v243_v21  ;;  %v308_v27 = vcombine.high %v211_v11, %v275_v20  ;;  %v292_v28 = vcombine.high %v179_v12, %v243_v21 }
  0xc6   : > { %v315_v25 = vrot.slane %v307_v23, %v2697_v19  ;;  %v299_v26 = vrot.slane %v291_v24, %v2697_v19  ;;  %v322_v32 = vrot.slane %v308_v27, %v2697_v19  ;;  %v306_v33 = vrot.slane %v292_v28, %v2697_v19 }
  0xc7   : > { %v276_v37 = vpop.trf.xlu1  ;;  %v244_v38 = vpop.trf.xlu0 }
  0xc8   : > { %v323_v30 = vcombine.low %v299_v26, %v315_v25  ;;  %v324_v31 = vcombine.high %v299_v26, %v315_v25  ;;  %v339_v40 = vcombine.low %v306_v33, %v322_v32  ;;  %v375_v41 = vcombine.low %v212_v15, %v276_v37 }
  0xc9   : > { %v359_v42 = vcombine.low %v180_v16, %v244_v38  ;;  %v340_v45 = vcombine.high %v306_v33, %v322_v32  ;;  %v376_v51 = vcombine.high %v212_v15, %v276_v37  ;;  %v360_v52 = vcombine.high %v180_v16, %v244_v38 }
  0xca   : > { %v331_v34 = vrot.slane %v323_v30, %v2701_v29  ;;  %v338_v39 = vrot.slane %v324_v31, %v2701_v29  ;;  %v347_v44 = vrot.slane %v339_v40, %v2701_v29  ;;  %v383_v46 = vrot.slane %v375_v41, %v2697_v19 }
  0xcb   : > { %v367_v47 = vrot.slane %v359_v42, %v2697_v19  ;;  %v354_v49 = vrot.slane %v340_v45, %v2701_v29  ;;  %v390_v56 = vrot.slane %v376_v51, %v2697_v19  ;;  %v374_v57 = vrot.slane %v360_v52, %v2697_v19 }
  0xcc   : > { %427 = vxpose.xlu0.b32.start.end [1/1] (short) (narrow) %v331_v34, 16  ;;  %v355_v36 = vcombine.high %v331_v34, %v2549_v35  ;;  %v356_v43 = vcombine.high %v338_v39, %v2549_v35  ;;  %v357_v48 = vcombine.high %v347_v44, %v2549_v35 }
  0xcd   : > { %v391_v50 = vcombine.low %v367_v47, %v383_v46  ;;  %v358_v53 = vcombine.high %v354_v49, %v2549_v35  ;;  %v392_v55 = vcombine.high %v367_v47, %v383_v46  ;;  %v407_v60 = vcombine.low %v374_v57, %v390_v56 }
  0xce   : > { %459 = vxpose.xlu1.b32.start.end [1/1] (short) (narrow) %v355_v36, 16  ;;  %v408_v63 = vcombine.high %v374_v57, %v390_v56 }
  0xcf   : > { %v399_v54 = vrot.slane %v391_v50, %v2701_v29  ;;  %v406_v59 = vrot.slane %v392_v55, %v2701_v29  ;;  %v415_v62 = vrot.slane %v407_v60, %v2701_v29 }
  0xd0   : > { %v422_v1 = vrot.slane %v408_v63, %v2701_v29 }
  0xd1   : > { %491 = vxpose.xlu0.b32.start.end [1/1] (short) (narrow) %v338_v39, 16  ;;  %v423_v58 = vcombine.high %v399_v54, %v2549_v35  ;;  %v424_v61 = vcombine.high %v406_v59, %v2549_v35  ;;  %v425_v0 = vcombine.high %v415_v62, %v2549_v35 }
  0xd2   : > { %v426_v2 = vcombine.high %v422_v1, %v2549_v35 }
  0xd3   : > { %523 = vxpose.xlu1.b32.start.end [1/1] (short) (narrow) %v356_v43, 16 }
  0xd6   : > { %555 = vxpose.xlu0.b32.start.end [1/1] (short) (narrow) %v347_v44, 16 }
  0xd8   : > { %587 = vxpose.xlu1.b32.start.end [1/1] (short) (narrow) %v357_v48, 16 }
  0xdb   : > { %619 = vxpose.xlu0.b32.start.end [1/1] (short) (narrow) %v354_v49, 16 }
  0xdd   : > { %651 = vxpose.xlu1.b32.start.end [1/1] (short) (narrow) %v358_v53, 16 }
  0xe0   : > { %683 = vxpose.xlu0.b32.start.end [1/1] (short) (narrow) %v399_v54, 16 }
  0xe2   : > { %715 = vxpose.xlu1.b32.start.end [1/1] (short) (narrow) %v423_v58, 16 }
  0xe5   : > { %747 = vxpose.xlu0.b32.start.end [1/1] (short) (narrow) %v406_v59, 16 }
  0xe7   : > { %779 = vxpose.xlu1.b32.start.end [1/1] (short) (narrow) %v424_v61, 16 }
  0xea   : > { %811 = vxpose.xlu0.b32.start.end [1/1] (short) (narrow) %v415_v62, 16 }
  0xec   : > { %843 = vxpose.xlu1.b32.start.end [1/1] (short) (narrow) %v425_v0, 16 }
  0xef   : > { %875 = vxpose.xlu0.b32.start.end [1/1] (short) (narrow) %v422_v1, 16 }
  0xf1   : > { %907 = vxpose.xlu1.b32.start.end [1/1] (short) (narrow) %v426_v2, 16 }
 0x14c   : > { %v443_v3 = vpop.trf.xlu0 }
 0x14e   : > { %v475_v4 = vpop.trf.xlu1 }
 0x150   : > { %v444_v5 = vpop.trf.xlu0 }
 0x152   : > { %v476_v6 = vpop.trf.xlu1 }
 0x154   : > { %v507_v7 = vpop.trf.xlu0 }
 0x155   : > { %v939_v8 = vcombine.low %v443_v3, %v507_v7  ;;  %v940_v9 = vcombine.high %v443_v3, %v507_v7 }
 0x156   : > { %v539_v10 = vpop.trf.xlu1 }
 0x157   : > { %v955_v11 = vcombine.low %v475_v4, %v539_v10  ;;  %v956_v12 = vcombine.high %v475_v4, %v539_v10  ;;  %v947_v14 = vrot.slane %v939_v8, %v2697_v19  ;;  %v954_v15 = vrot.slane %v940_v9, %v2697_v19 }
 0x158   : > { %v508_v13 = vpop.trf.xlu0 }
 0x159   : > { %v963_v16 = vrot.slane %v955_v11, %v2697_v19  ;;  %v970_v17 = vrot.slane %v956_v12, %v2697_v19  ;;  %v1211_v18 = vcombine.low %v444_v5, %v508_v13  ;;  %v1212_v20 = vcombine.high %v444_v5, %v508_v13 }
 0x15a   : > { %v540_v21 = vpop.trf.xlu1 }
 0x15b   : > { %v1003_v22 = vcombine.low %v947_v14, %v963_v16  ;;  %v1004_v23 = vcombine.high %v947_v14, %v963_v16  ;;  %v1019_v24 = vcombine.low %v954_v15, %v970_v17  ;;  %v1020_v25 = vcombine.high %v954_v15, %v970_v17 }
 0x15c   : > { %v1227_v26 = vcombine.low %v476_v6, %v540_v21  ;;  %v1228_v27 = vcombine.high %v476_v6, %v540_v21  ;;  %v571_v28 = vpop.trf.xlu0  ;;  %v1219_v34 = vrot.slane %v1211_v18, %v2697_v19  ;;  %v1226_v35 = vrot.slane %v1212_v20, %v2697_v19 }
 0x15d   : > { %v1011_v30 = vrot.slane %v1003_v22, %v2701_v29  ;;  %v1018_v31 = vrot.slane %v1004_v23, %v2701_v29  ;;  %v1027_v32 = vrot.slane %v1019_v24, %v2701_v29  ;;  %v1034_v33 = vrot.slane %v1020_v25, %v2701_v29 }
 0x15e   : > { %v1235_v36 = vrot.slane %v1227_v26, %v2697_v19  ;;  %v1242_v37 = vrot.slane %v1228_v27, %v2697_v19  ;;  %v603_v38 = vpop.trf.xlu1 }
 0x15f   : > { %v2308_v39 = vcombine.low %v1011_v30, %v1018_v31  ;;  %v2310_v40 = vcombine.high %v1011_v30, %v1018_v31  ;;  %v2312_v41 = vcombine.low %v1027_v32, %v1034_v33  ;;  %v2314_v42 = vcombine.high %v1027_v32, %v1034_v33 }
 0x160   : > { %v1275_v43 = vcombine.low %v1219_v34, %v1235_v36  ;;  %v1276_v44 = vcombine.high %v1219_v34, %v1235_v36  ;;  %v1291_v45 = vcombine.low %v1226_v35, %v1242_v37  ;;  %v1292_v46 = vcombine.high %v1226_v35, %v1242_v37  ;;  %v572_v47 = vpop.trf.xlu0 }
 0x161   : > { %v1491_v48 = vrot.slane %v2308_v39, %v2697_v19  ;;  %v1507_v49 = vrot.slane %v2310_v40, %v2697_v19  ;;  %v1523_v50 = vrot.slane %v2312_v41, %v2697_v19  ;;  %v1539_v51 = vrot.slane %v2314_v42, %v2697_v19 }
 0x162   : > { %v1283_v52 = vrot.slane %v1275_v43, %v2701_v29  ;;  %v1290_v53 = vrot.slane %v1276_v44, %v2701_v29  ;;  %v1299_v54 = vrot.slane %v1291_v45, %v2701_v29  ;;  %v1306_v55 = vrot.slane %v1292_v46, %v2701_v29  ;;  %v604_v56 = vpop.trf.xlu1 }
 0x163   : > { %v1548_v57 = vcombine.high %v1491_v48, %v1507_v49  ;;  %v1580_v58 = vcombine.high %v1523_v50, %v1539_v51  ;;  %v1547_v59 = vcombine.low %v1491_v48, %v1507_v49  ;;  %v1579_v60 = vcombine.low %v1523_v50, %v1539_v51 }
 0x164   : > { %v2316_v61 = vcombine.low %v1283_v52, %v1290_v53  ;;  %v2318_v62 = vcombine.high %v1283_v52, %v1290_v53  ;;  %v2320_v63 = vcombine.low %v1299_v54, %v1306_v55  ;;  %v2322_v0 = vcombine.high %v1299_v54, %v1306_v55  ;;  %v635_v1 = vpop.trf.xlu0 }
 0x165   : > { %v971_v2 = vcombine.low %v571_v28, %v635_v1  ;;  %v972_v3 = vcombine.high %v571_v28, %v635_v1  ;;  %v1562_v4 = vrot.slane %v1548_v57, %v2701_v29  ;;  %v1594_v5 = vrot.slane %v1580_v58, %v2701_v29 }
 0x166   : > { %v667_v6 = vpop.trf.xlu1  ;;  %v2740_v7 = vrot.slane %v1547_v59, %v2701_v29  ;;  %v2743_v8 = vrot.slane %v1579_v60, %v2701_v29  ;;  %v2746_v9 = vrot.slane %v2316_v61, %v2697_v19  ;;  %v2749_v10 = vrot.slane %v2318_v62, %v2697_v19 }
 0x167   : > { %v979_v11 = vrot.slane %v971_v2, %v2697_v19  ;;  %v987_v12 = vcombine.low %v603_v38, %v667_v6  ;;  %v988_v13 = vcombine.high %v603_v38, %v667_v6  ;;  %v986_v14 = vrot.slane %v972_v3, %v2697_v19 }
 0x168   : > { %v636_v15 = vpop.trf.xlu0  ;;  %v1613_v16 = vcombine.low %v1562_v4, %v1594_v5  ;;  %v1612_v17 = vcombine.high %v2740_v7, %v2743_v8  ;;  %v1614_v18 = vcombine.high %v1562_v4, %v1594_v5  ;;  %v2760_v25 = vrot.slane %v2320_v63, %v2697_v19 }
 0x169   : > { %v995_v20 = vrot.slane %v987_v12, %v2697_v19  ;;  %v1002_v21 = vrot.slane %v988_v13, %v2697_v19  ;;  %v1243_v22 = vcombine.low %v572_v47, %v636_v15  ;;  %v1244_v23 = vcombine.high %v572_v47, %v636_v15 }
 0x16a   : > { %2037 = vrot.lane.b32.xlu1 %v1613_v16, %s2550_s18  ;;  %2029 = vrot.lane.b32.xlu0 %v1612_v17, %s2551_s27  ;;  %v668_v24 = vpop.trf.xlu1  ;;  %v2763_v26 = vrot.slane %v2322_v0, %v2697_v19  ;;  %v1684_v27 = vcombine.high %v2746_v9, %v2749_v10 }
 0x16b   : > { %v1035_v28 = vcombine.low %v979_v11, %v995_v20  ;;  %v1036_v30 = vcombine.high %v979_v11, %v995_v20  ;;  %v1051_v31 = vcombine.low %v986_v14, %v1002_v21  ;;  %v1052_v32 = vcombine.high %v986_v14, %v1002_v21 }
 0x16c   : > { %v1251_v33 = vrot.slane %v1243_v22, %v2697_v19  ;;  %v1258_v34 = vrot.slane %v1244_v23, %v2697_v19  ;;  %v1259_v35 = vcombine.low %v604_v56, %v668_v24  ;;  %v1260_v36 = vcombine.high %v604_v56, %v668_v24  ;;  %v699_v37 = vpop.trf.xlu0 }
 0x16d   : > { %v1043_v38 = vrot.slane %v1035_v28, %v2701_v29  ;;  %v1050_v39 = vrot.slane %v1036_v30, %v2701_v29  ;;  %v1059_v40 = vrot.slane %v1051_v31, %v2701_v29  ;;  %v1066_v41 = vrot.slane %v1052_v32, %v2701_v29 }
 0x16e   : > { %v1267_v42 = vrot.slane %v1259_v35, %v2697_v19  ;;  %v1274_v43 = vrot.slane %v1260_v36, %v2697_v19  ;;  %2045 = vrot.lane.b32.xlu1 %v1614_v18, %s2552_s29  ;;  %v2777_v44 = vrot.slane %v1684_v27, %v2701_v29  ;;  %v1716_v45 = vcombine.high %v2760_v25, %v2763_v26  ;;  %v731_v46 = vpop.trf.xlu1 }
 0x16f   : > { %v2309_v47 = vcombine.low %v1043_v38, %v1050_v39  ;;  %v2311_v48 = vcombine.high %v1043_v38, %v1050_v39  ;;  %v2313_v49 = vcombine.low %v1059_v40, %v1066_v41  ;;  %v2315_v50 = vcombine.high %v1059_v40, %v1066_v41 }
 0x170   : > { %v1307_v51 = vcombine.low %v1251_v33, %v1267_v42  ;;  %v1308_v52 = vcombine.high %v1251_v33, %v1267_v42  ;;  %v1323_v53 = vcombine.low %v1258_v34, %v1274_v43  ;;  %v1324_v54 = vcombine.high %v1258_v34, %v1274_v43  ;;  %v700_v55 = vpop.trf.xlu0 }
 0x171   : > { %v2782_v56 = vrot.slane %v1716_v45, %v2701_v29  ;;  %v2785_v57 = vrot.slane %v2309_v47, %v2697_v19  ;;  %v2788_v58 = vrot.slane %v2311_v48, %v2697_v19  ;;  %v2791_v59 = vrot.slane %v2313_v49, %v2697_v19 }
 0x172   : > { %v1315_v60 = vrot.slane %v1307_v51, %v2701_v29  ;;  %v1322_v61 = vrot.slane %v1308_v52, %v2701_v29  ;;  %v1331_v62 = vrot.slane %v1323_v53, %v2701_v29  ;;  %v1338_v63 = vrot.slane %v1324_v54, %v2701_v29  ;;  %v732_v0 = vpop.trf.xlu1 }
 0x173   : > { %v1750_v1 = vcombine.high %v2777_v44, %v2782_v56  ;;  %v2800_v2 = vrot.slane %v2315_v50, %v2697_v19  ;;  %v1563_v3 = vcombine.low %v2785_v57, %v2788_v58  ;;  %v1564_v42 = vcombine.high %v2785_v57, %v2788_v58 }
 0x174   : > { %v2317_v4 = vcombine.low %v1315_v60, %v1322_v61  ;;  %v2319_v5 = vcombine.high %v1315_v60, %v1322_v61  ;;  %v2321_v6 = vcombine.low %v1331_v62, %v1338_v63  ;;  %v2323_v11 = vcombine.high %v1331_v62, %v1338_v63  ;;  %v763_v12 = vpop.trf.xlu0 }
 0x175   : > { %2047 = vrot.lane.b32.xlu0 %v1750_v1, %s2552_s29  ;;  %v1075_v13 = vcombine.low %v699_v37, %v763_v12  ;;  %v1076_v14 = vcombine.high %v699_v37, %v763_v12  ;;  %v1571_v15 = vrot.slane %v1563_v3, %v2701_v29  ;;  %v1595_v16 = vcombine.low %v2791_v59, %v2800_v2 }
 0x176   : > { %v795_v17 = vpop.trf.xlu1  ;;  %v2809_v18 = vrot.slane %v2317_v4, %v2697_v19  ;;  %v2812_v20 = vrot.slane %v2319_v5, %v2697_v19  ;;  %v2815_v21 = vrot.slane %v2321_v6, %v2697_v19  ;;  %v1682_v22 = vrot.slane %v2323_v11, %v2697_v19 }
 0x177   : > { %v1083_v23 = vrot.slane %v1075_v13, %v2697_v19  ;;  %v1091_v24 = vcombine.low %v731_v46, %v795_v17  ;;  %v1092_v27 = vcombine.high %v731_v46, %v795_v17  ;;  %v1090_v28 = vrot.slane %v1076_v14, %v2697_v19 }
 0x178   : > { %v764_v30 = vpop.trf.xlu0  ;;  %v1603_v31 = vrot.slane %v1595_v16, %v2701_v29  ;;  %v1699_v32 = vcombine.low %v2809_v18, %v2812_v20  ;;  %v1731_v33 = vcombine.low %v2815_v21, %v1682_v22  ;;  %v1596_v62 = vcombine.high %v2791_v59, %v2800_v2 }
 0x179   : > { %v1099_v34 = vrot.slane %v1091_v24, %v2697_v19  ;;  %v1106_v35 = vrot.slane %v1092_v27, %v2697_v19  ;;  %v1347_v36 = vcombine.low %v700_v55, %v764_v30  ;;  %v1348_v37 = vcombine.high %v700_v55, %v764_v30 }
 0x17a   : > { %v1615_v38 = vcombine.low %v1571_v15, %v1603_v31  ;;  %v796_v39 = vpop.trf.xlu1  ;;  %v1707_v40 = vrot.slane %v1699_v32, %v2701_v29  ;;  %v1739_v41 = vrot.slane %v1731_v33, %v2701_v29  ;;  %v1616_v51 = vcombine.high %v1571_v15, %v1603_v31 }
 0x17b   : > { %v1139_v43 = vcombine.low %v1083_v23, %v1099_v34  ;;  %v1140_v45 = vcombine.high %v1083_v23, %v1099_v34  ;;  %v1155_v46 = vcombine.low %v1090_v28, %v1106_v35  ;;  %v1156_v47 = vcombine.high %v1090_v28, %v1106_v35 }
 0x17c   : > { %2053 = vrot.lane.b32.xlu1 %v1615_v38, %s2553_s30  ;;  %v1363_v48 = vcombine.low %v732_v0, %v796_v39  ;;  %v1364_v49 = vcombine.high %v732_v0, %v796_v39  ;;  %v827_v50 = vpop.trf.xlu0  ;;  %v1355_v54 = vrot.slane %v1347_v36, %v2697_v19  ;;  %v1362_v55 = vrot.slane %v1348_v37, %v2697_v19 }
 0x17d   : > { %v2831_v52 = vrot.slane %v1139_v43, %v2701_v29  ;;  %v2834_v53 = vrot.slane %v1140_v45, %v2701_v29  ;;  %v1751_v60 = vcombine.low %v1707_v40, %v1739_v41  ;;  %v2843_v63 = vrot.slane %v1155_v46, %v2701_v29 }
 0x17e   : > { %v1371_v57 = vrot.slane %v1363_v48, %v2697_v19  ;;  %v1378_v58 = vrot.slane %v1364_v49, %v2697_v19  ;;  %v859_v61 = vpop.trf.xlu1  ;;  %v2846_v0 = vrot.slane %v1156_v47, %v2701_v29  ;;  %v1578_v1 = vrot.slane %v1564_v42, %v2701_v29 }
 0x17f   : > { %v1683_v3 = vcombine.low %v2746_v9, %v2749_v10  ;;  %v2324_v59 = vcombine.low %v2831_v52, %v2834_v53  ;;  %2055 = vrot.lane.b32.xlu0 %v1751_v60, %s2553_s30  ;;  %v1610_v2 = vrot.slane %v1596_v62, %v2701_v29  ;;  %v1700_v13 = vcombine.high %v2809_v18, %v2812_v20 }
 0x180   : > { %v1411_v4 = vcombine.low %v1355_v54, %v1371_v57  ;;  %v1412_v5 = vcombine.high %v1355_v54, %v1371_v57  ;;  %v1427_v6 = vcombine.low %v1362_v55, %v1378_v58  ;;  %v1428_v11 = vcombine.high %v1362_v55, %v1378_v58  ;;  %2061 = vrot.lane.b32.xlu1 %v1616_v51, %s2554_s2  ;;  %v828_v12 = vpop.trf.xlu0 }
 0x181   : > { %v1732_v14 = vcombine.high %v2815_v21, %v1682_v22  ;;  %v1617_v23 = vcombine.low %v1578_v1, %v1610_v2  ;;  %v1752_v24 = vcombine.high %v1707_v40, %v1739_v41  ;;  %v1714_v27 = vrot.slane %v1700_v13, %v2701_v29 }
 0x182   : > { %v1419_v9 = vrot.slane %v1411_v4, %v2701_v29  ;;  %v1426_v10 = vrot.slane %v1412_v5, %v2701_v29  ;;  %v1435_v15 = vrot.slane %v1427_v6, %v2701_v29  ;;  %v1442_v16 = vrot.slane %v1428_v11, %v2701_v29  ;;  %v860_v17 = vpop.trf.xlu1 }
 0x183   : > { %v1746_v28 = vrot.slane %v1732_v14, %v2701_v29  ;;  %v2326_v18 = vcombine.high %v2831_v52, %v2834_v53  ;;  %2063 = vrot.lane.b32.xlu0 %v1752_v24, %s2554_s2  ;;  %v1618_v33 = vcombine.high %v1578_v1, %v1610_v2  ;;  %v2866_v37 = vrot.slane %v1683_v3, %v2701_v29 }
 0x184   : > { %v2332_v20 = vcombine.low %v1419_v9, %v1426_v10  ;;  %v2334_v21 = vcombine.high %v1419_v9, %v1426_v10  ;;  %v2336_v22 = vcombine.low %v1435_v15, %v1442_v16  ;;  %v891_v30 = vpop.trf.xlu0  ;;  %2069 = vrot.lane.b32.xlu1 %v1617_v23, %s2555_s5  ;;  %v2338_v34 = vcombine.high %v1435_v15, %v1442_v16 }
 0x185   : > { %v1107_v31 = vcombine.low %v827_v50, %v891_v30  ;;  %v1108_v32 = vcombine.high %v827_v50, %v891_v30  ;;  %v1753_v35 = vcombine.low %v1714_v27, %v1746_v28  ;;  %v1715_v38 = vcombine.low %v2760_v25, %v2763_v26 }
 0x186   : > { %v923_v36 = vpop.trf.xlu1  ;;  %v2876_v46 = vrot.slane %v2332_v20, %v2697_v19  ;;  %v2879_v47 = vrot.slane %v2334_v21, %v2697_v19  ;;  %v2882_v48 = vrot.slane %v2336_v22, %v2697_v19  ;;  %v1947_v55 = vrot.slane %v2338_v34, %v2697_v19 }
 0x187   : > { %v1115_v39 = vrot.slane %v1107_v31, %v2697_v19  ;;  %v1122_v40 = vrot.slane %v1108_v32, %v2697_v19  ;;  %v1123_v41 = vcombine.low %v859_v61, %v923_v36  ;;  %v1124_v42 = vcombine.high %v859_v61, %v923_v36  ;;  %2071 = vrot.lane.b32.xlu0 %v1753_v35, %s2555_s5  ;;  %s2460_s5 = scalar_lea.vmem %s2991_s4, 256 }
 0x188   : > { %v892_v43 = vpop.trf.xlu0  ;;  %v2873_v45 = vrot.slane %v1715_v38, %v2701_v29  ;;  %2077 = vrot.lane.b32.xlu1 %v1618_v33, %s2556_s12  ;;  %v1955_v57 = vcombine.low %v2876_v46, %v2879_v47  ;;  %v2328_v1 = vcombine.low %v2843_v63, %v2846_v0  ;;  %v1754_v3 = vcombine.high %v1714_v27, %v1746_v28  ;;  %p2461_p8 = scmp.ne.s32.totalorder %s2991_s4, %s2460_s5 }
 0x189   : > { %v1131_v25 = vrot.slane %v1123_v41, %v2697_v19  ;;  %v1138_v26 = vrot.slane %v1124_v42, %v2697_v19  ;;  %v1379_v49 = vcombine.low %v828_v12, %v892_v43  ;;  %v1380_v50 = vcombine.high %v828_v12, %v892_v43 }
 0x18a   : > { %v1748_v51 = vcombine.high %v2866_v37, %v2873_v45  ;;  %v924_v54 = vpop.trf.xlu1  ;;  %v2330_v6 = vcombine.high %v2843_v63, %v2846_v0  ;;  %v1749_v2 = vcombine.low %v2777_v44, %v2782_v56  ;;  %v1987_v10 = vcombine.low %v2882_v48, %v1947_v55  ;;  %p2462_p11 = pnand %p2461_p8, %p3058_p9 }
 0x18b   : > { %v1171_v58 = vcombine.low %v1115_v39, %v1131_v25  ;;  %v1172_v60 = vcombine.high %v1115_v39, %v1131_v25  ;;  %v1187_v61 = vcombine.low %v1122_v40, %v1138_v26  ;;  %v1188_v62 = vcombine.high %v1122_v40, %v1138_v26  ;;  %2079 = vrot.lane.b32.xlu0 %v1754_v3, %s2556_s12  ;;  %s2565_s12 = smov [#allocation5]  }
 0x18c   : > { %v1395_v4 = vcombine.low %v860_v17, %v924_v54  ;;  %v1396_v5 = vcombine.high %v860_v17, %v924_v54  ;;  %v1387_v11 = vrot.slane %v1379_v49, %v2697_v19  ;;  %v1394_v12 = vrot.slane %v1380_v50, %v2697_v19  ;;  %2031 = vrot.lane.b32.xlu1 %v1748_v51, %s2551_s27  ;;  %s2346_s27 = sshll.u32 %s2534_s9, 8  ;;  %s2196_s9 = scalar_lea.sflag [#allocation4], %s2689_s26 }
 0x18d   : > { %v2901_v13 = vrot.slane %v1171_v58, %v2701_v29  ;;  %v1186_v63 = vrot.slane %v1172_v60, %v2701_v29  ;;  %v1195_v0 = vrot.slane %v1187_v61, %v2701_v29  ;;  %v1202_v15 = vrot.slane %v1188_v62, %v2701_v29  ;;  %s2997_s2 = scalar_lea.hbm %s3050_s1, %s2346_s27  ;;  %p2463_p0 = pneg %p2462_p11 }
 0x18e   : > { %v1403_v14 = vrot.slane %v1395_v4, %v2697_v19  ;;  %v1410_v9 = vrot.slane %v1396_v5, %v2697_v19  ;;  %v1963_v16 = vrot.slane %v1955_v57, %v2701_v29  ;;  %v1995_v24 = vrot.slane %v1987_v10, %v2701_v29 }
 0x18f   : > { %v1763_v27 = vrot.slane %v2324_v59, %v2697_v19  ;;  %v1779_v28 = vrot.slane %v2326_v18, %v2697_v19  ;;  %v1795_v20 = vrot.slane %v2328_v1, %v2697_v19  ;;  %v1811_v33 = vrot.slane %v2330_v6, %v2697_v19 }
 0x190   : > { %v1443_v17 = vcombine.low %v1387_v11, %v1403_v14  ;;  %v1444_v44 = vcombine.high %v1387_v11, %v1403_v14  ;;  %v1459_v56 = vcombine.low %v1394_v12, %v1410_v9  ;;  %v1460_v23 = vcombine.high %v1394_v12, %v1410_v9  ;;  %2039 = vrot.lane.b32.xlu1 %v1749_v2, %s2550_s18 }
 0x191   : > { %v2019_v32 = vcombine.low %v1963_v16, %v1995_v24  ;;  %v1819_v34 = vcombine.low %v1763_v27, %v1779_v28  ;;  %v2020_v59 = vcombine.high %v1963_v16, %v1995_v24  ;;  %v1851_v18 = vcombine.low %v1795_v20, %v1811_v33 }
 0x192   : > { %v1451_v21 = vrot.slane %v1443_v17, %v2701_v29  ;;  %v1458_v22 = vrot.slane %v1444_v44, %v2701_v29  ;;  %v1467_v30 = vrot.slane %v1459_v56, %v2701_v29  ;;  %v1474_v31 = vrot.slane %v1460_v23, %v2701_v29 }
 0x193   : > { %2087 = vrot.lane.b32.xlu0 %v2019_v32, %s2557_s13  ;;  %v1827_v53 = vrot.slane %v1819_v34, %v2701_v29  ;;  %v1956_v39 = vcombine.high %v2876_v46, %v2879_v47  ;;  %v1988_v40 = vcombine.high %v2882_v48, %v1947_v55  ;;  %v1820_v41 = vcombine.high %v1763_v27, %v1779_v28 }
 0x194   : > { %v2333_v35 = vcombine.low %v1451_v21, %v1458_v22  ;;  %v2335_v36 = vcombine.high %v1451_v21, %v1458_v22  ;;  %v2337_v38 = vcombine.low %v1467_v30, %v1474_v31  ;;  %v2339_v52 = vcombine.high %v1467_v30, %v1474_v31 }
 0x195   : > { %v1852_v42 = vcombine.high %v1795_v20, %v1811_v33  ;;  %v1859_v26 = vrot.slane %v1851_v18, %v2701_v29  ;;  %v1970_v49 = vrot.slane %v1956_v39, %v2701_v29  ;;  %v2002_v50 = vrot.slane %v1988_v40, %v2701_v29 }
 0x196   : > { %v1906_v43 = vrot.slane %v2333_v35, %v2697_v19  ;;  %v1922_v25 = vrot.slane %v2335_v36, %v2697_v19  ;;  %v1938_v51 = vrot.slane %v2337_v38, %v2697_v19  ;;  %v2325_v54 = vcombine.low %v2901_v13, %v1186_v63 }
 0x197   : > { %v1954_v46 = vrot.slane %v2339_v52, %v2697_v19  ;;  %v2327_v48 = vcombine.high %v2901_v13, %v1186_v63  ;;  %v2329_v55 = vcombine.low %v1195_v0, %v1202_v15  ;;  %v2331_v57 = vcombine.high %v1195_v0, %v1202_v15  ;;  %2095 = vrot.lane.b32.xlu0 %v2020_v59, %s2558_s15 }
 0x198   : > { %v1971_v47 = vcombine.low %v1906_v43, %v1922_v25  ;;  %v1883_v58 = vcombine.low %v1827_v53, %v1859_v26  ;;  %v2021_v61 = vcombine.low %v1970_v49, %v2002_v50  ;;  %v1834_v62 = vrot.slane %v1820_v41, %v2701_v29 }
 0x199   : > { %v2003_v60 = vcombine.low %v1938_v51, %v1954_v46  ;;  %v1866_v1 = vrot.slane %v1852_v42, %v2701_v29  ;;  %v1884_v3 = vcombine.high %v1827_v53, %v1859_v26  ;;  %v1770_v5 = vrot.slane %v2325_v54, %v2697_v19 }
 0x19a   : > { %2085 = vrot.lane.b32.xlu1 %v1883_v58, %s2557_s13  ;;  %v1979_v4 = vrot.slane %v1971_v47, %v2701_v29  ;;  %v1611_v6 = vcombine.low %v2740_v7, %v2743_v8  ;;  %v1786_v12 = vrot.slane %v2327_v48, %v2697_v19  ;;  %v1802_v2 = vrot.slane %v2329_v55, %v2697_v19  ;;  %s2464_s13 = sshll.u32 %s2565_s12, 4  ;;  %s2465_s13 = int_to_ptr.vmem [resolvable:$false] %s2464_s13 }
 0x19b   : > { %2103 = vrot.lane.b32.xlu0 %v2021_v61, %s2559_s16  ;;  %v2011_v11 = vrot.slane %v2003_v60, %v2701_v29  ;;  %v1818_v13 = vrot.slane %v2331_v57, %v2697_v19  ;;  %v2022_v14 = vcombine.high %v1970_v49, %v2002_v50  ;;  %v1885_v9 = vcombine.low %v1834_v62, %v1866_v1  ;;  %p2467_p6 = scmp.lt.s32.totalorder %s2991_s4, %s2465_s13 }
 0x19c   : > { %v1835_v63 = vcombine.low %v1770_v5, %v1786_v12  ;;  %v1747_v15 = vcombine.low %v2866_v37, %v2873_v45  ;;  %v1972_v16 = vcombine.high %v1906_v43, %v1922_v25  ;;  %v2004_v17 = vcombine.high %v1938_v51, %v1954_v46 }
 0x19d   : > { %v2023_v10 = vcombine.low %v1979_v4, %v2011_v11  ;;  %v1867_v0 = vcombine.low %v1802_v2, %v1818_v13  ;;  %v1886_v44 = vcombine.high %v1834_v62, %v1866_v1  ;;  %v2024_v23 = vcombine.high %v1979_v4, %v2011_v11 }
 0x19e   : > { %2093 = vrot.lane.b32.xlu1 %v1884_v3, %s2558_s15  ;;  %v1843_v56 = vrot.slane %v1835_v63, %v2701_v29  ;;  %v1986_v24 = vrot.slane %v1972_v16, %v2701_v29  ;;  %v2018_v27 = vrot.slane %v2004_v17, %v2701_v29  ;;  %v1836_v37 = vcombine.high %v1770_v5, %v1786_v12  ;;  %s2466_s15 = scalar_lea.vmem %s2465_s13, 512 }
 0x19f   : > { %2111 = vrot.lane.b32.xlu0 %v2022_v14, %s2560_s17  ;;  %v1875_v19 = vrot.slane %v1867_v0, %v2701_v29  ;;  %v1868_v45 = vcombine.high %v1802_v2, %v1818_v13  ;;  %p2468_p13 = scmp.lt.s32.totalorder %s2466_s15, %s2460_s5 }
 0x1a0   : > { %v2025_v20 = vcombine.low %v1986_v24, %v2018_v27  ;;  %v1850_v22 = vrot.slane %v1836_v37, %v2701_v29  ;;  %v2026_v31 = vcombine.high %v1986_v24, %v2018_v27 }
 0x1a1   : > { %v1887_v28 = vcombine.low %v1843_v56, %v1875_v19  ;;  %v1888_v21 = vcombine.high %v1843_v56, %v1875_v19  ;;  %v1882_v30 = vrot.slane %v1868_v45, %v2701_v29  ;;  %p2469_p2 = por %p2468_p13, %p2467_p6 }
 0x1a2   : > { %2101 = vrot.lane.b32.xlu1 %v1885_v9, %s2559_s16 }
 0x1a3   : > { %2119 = vrot.lane.b32.xlu0 %v2023_v10, %s2561_s22  ;;  %v1889_v32 = vcombine.low %v1850_v22, %v1882_v30  ;;  %v1890_v33 = vcombine.high %v1850_v22, %v1882_v30  ;;  %p2470_p5 = pnand %p2469_p2, %p2463_p0 }
 0x1a6   : > { %2109 = vrot.lane.b32.xlu1 %v1886_v44, %s2560_s17 }
 0x1a7   : > { %2127 = vrot.lane.b32.xlu0 %v2024_v23, %s2562_s23 }
 0x1aa   : > { %2117 = vrot.lane.b32.xlu1 %v1887_v28, %s2561_s22 }
 0x1ab   : > { %2135 = vrot.lane.b32.xlu0 %v2025_v20, %s2563_s24 }
 0x1ae   : > { %2125 = vrot.lane.b32.xlu1 %v1888_v21, %s2562_s23 }
 0x1af   : > { %2143 = vrot.lane.b32.xlu0 %v2026_v31, %s2564_s25 }
 0x1b2   : > { %2133 = vrot.lane.b32.xlu1 %v1889_v32, %s2563_s24 }
 0x1b6   : > { %2141 = vrot.lane.b32.xlu1 %v1890_v33, %s2564_s25 }
 0x1dc   : > { %v2038_v34 = vpop.permute.xlu1 %2037  ;;  %v2030_v59 = vpop.permute.xlu0 %2029 }
 0x1dd   : > { %v2148_v4 = vsel %vm2147_vm0, %v1611_v6, %v2030_v59 }
 0x1de   : > { %v2151_v12 = vsel %vm2150_vm1, %v2148_v4, %v2038_v34 }
 0x1e0   : > { %v2046_v35 = vpop.permute.xlu1 %2045 }
 0x1e1   : > { %v2154_v13 = vsel %vm2153_vm2, %v2151_v12, %v2046_v35 }
 0x1e7   : > { %v2048_v38 = vpop.permute.xlu0 %2047 }
 0x1ee   : > { %v2054_v36 = vpop.permute.xlu1 %2053 }
 0x1ef   : > { %v2157_v14 = vsel %vm2156_vm3, %v2154_v13, %v2054_v36 }
 0x1f1   : > { %v2056_v53 = vpop.permute.xlu0 %2055 }
 0x1f2   : > { %v2062_v52 = vpop.permute.xlu1 %2061 }
 0x1f3   : > { %v2160_v7 = vsel %vm2159_vm4, %v2157_v14, %v2062_v52 }
 0x1f5   : > { %v2064_v39 = vpop.permute.xlu0 %2063 }
 0x1f6   : > { %v2070_v18 = vpop.permute.xlu1 %2069 }
 0x1f7   : > { %v2163_v6 = vsel %vm2162_vm5, %v2160_v7, %v2070_v18 }
 0x1f9   : > { %v2072_v41 = vpop.permute.xlu0 %2071 }
 0x1fa   : > { %v2078_v40 = vpop.permute.xlu1 %2077 }
 0x1fd   : > { %v2080_v42 = vpop.permute.xlu0 %2079 }
 0x1fe   : > { %v2032_v29 = vpop.permute.xlu1 %2031 }
 0x1ff   : > { %v2149_v25 = vsel %vm2147_vm0, %v1747_v15, %v2032_v29  ;;  %v2166_v15 = vsel %vm2165_vm6, %v2163_v6, %v2078_v40 }
 0x202   : > { %v2040_v43 = vpop.permute.xlu1 %2039 }
 0x203   : > { %v2152_v26 = vsel %vm2150_vm1, %v2149_v25, %v2040_v43 }
 0x204   : > { %v2155_v50 = vsel %vm2153_vm2, %v2152_v26, %v2048_v38 }
 0x205   : > { %v2088_v49 = vpop.permute.xlu0 %2087  ;;  %v2158_v54 = vsel %vm2156_vm3, %v2155_v50, %v2056_v53 }
 0x206   : > { %v2161_v48 = vsel %vm2159_vm4, %v2158_v54, %v2064_v39 }
 0x207   : > { %v2164_v57 = vsel %vm2162_vm5, %v2161_v48, %v2072_v41 }
 0x208   : > { %v2167_v61 = vsel %vm2165_vm6, %v2164_v57, %v2080_v42 }
 0x209   : > { %v2096_v51 = vpop.permute.xlu0 %2095  ;;  %v2170_v1 = vsel %vm2168_vm7, %v2167_v61, %v2088_v49 }
 0x20a   : > { %v2173_v11 = vsel %vm2171_vm8, %v2170_v1, %v2096_v51 }
 0x20c   : > { %v2086_v46 = vpop.permute.xlu1 %2085 }
 0x20d   : > { %v2104_v47 = vpop.permute.xlu0 %2103  ;;  %v2169_v17 = vsel %vm2168_vm7, %v2166_v15, %v2086_v46 }
 0x20e   : > { %v2176_v9 = vsel %vm2174_vm9, %v2173_v11, %v2104_v47 }
 0x210   : > { %v2094_v55 = vpop.permute.xlu1 %2093 }
 0x211   : > { %v2112_v58 = vpop.permute.xlu0 %2111  ;;  %v2172_v19 = vsel %vm2171_vm8, %v2169_v17, %v2094_v55 }
 0x212   : > { %v2179_v8 = vsel %vm2177_vm10, %v2176_v9, %v2112_v58 }
 0x214   : > { %v2102_v60 = vpop.permute.xlu1 %2101 }
 0x215   : > { %v2120_v62 = vpop.permute.xlu0 %2119  ;;  %v2175_v24 = vsel %vm2174_vm9, %v2172_v19, %v2102_v60 }
 0x216   : > { %v2182_v63 = vsel %vm2180_vm11, %v2179_v8, %v2120_v62 }
 0x218   : > { %v2110_v3 = vpop.permute.xlu1 %2109 }
 0x219   : > { %v2128_v5 = vpop.permute.xlu0 %2127  ;;  %v2178_v28 = vsel %vm2177_vm10, %v2175_v24, %v2110_v3 }
 0x21a   : > { %v2185_v16 = vsel %vm2183_vm12, %v2182_v63, %v2128_v5 }
 0x21c   : > { %v2118_v2 = vpop.permute.xlu1 %2117 }
 0x21d   : > { %v2136_v10 = vpop.permute.xlu0 %2135  ;;  %v2181_v37 = vsel %vm2180_vm11, %v2178_v28, %v2118_v2 }
 0x21e   : > { %v2188_v44 = vsel %vm2186_vm13, %v2185_v16, %v2136_v10 }
 0x220   : > { %v2126_v0 = vpop.permute.xlu1 %2125 }
 0x221   : > { %v2144_v56 = vpop.permute.xlu0 %2143  ;;  %v2184_v45 = vsel %vm2183_vm12, %v2181_v37, %v2126_v0 }
 0x222   : > { %v2191_v23 = vsel %vm2189_vm14, %v2188_v44, %v2144_v56 }
 0x223   : > { %2194 = vst.msk [vmem:[%s152_s3 + $0x8] sm:$0xff] %vm2192_vm15, %v2191_v23 }
 0x224   : > { %v2134_v27 = vpop.permute.xlu1 %2133 }
 0x225   : > { %v2187_v20 = vsel %vm2186_vm13, %v2184_v45, %v2134_v27 }
 0x228   : > { %v2142_v21 = vpop.permute.xlu1 %2141 }
 0x229   : > { %v2190_v22 = vsel %vm2189_vm14, %v2187_v20, %v2142_v21 }
 0x22a   : > { %2193 = vst.msk [vmem:[%s152_s3] sm:$0xff] %vm2192_vm15, %v2190_v22 }
 0x22b   : > { %2473 = shalt.err (!%p2470_p5)
}
 0x22c   : > { %s2474_s16 = scalar_lea.hbm %s2997_s2, 256  ;;  %s2478_s23 = scalar_lea.hbm %s3050_s1, 512 }
 0x22d   : > { %p2475_p4 = scmp.ne.s32.totalorder %s2997_s2, %s2474_s16  ;;  %p2479_p12 = scmp.lt.u32.totalorder %s2997_s2, %s3050_s1 }
 0x22e   : > { %p2480_p1 = scmp.lt.u32.totalorder %s2478_s23, %s2474_s16  ;;  %p2482_p8 = scmp.lt.u32.totalorder %s2474_s16, %s2997_s2 }
 0x22f   : > { %p2476_p7 = pnand %p2475_p4, %p3058_p9 }
 0x230   : > { %p2481_p3 = por %p2480_p1, %p2479_p12 }
 0x231   : > { %p2477_p10 = pneg %p2476_p7 }
 0x232   : > { %p2483_p11 = por %p2482_p8, %p2481_p3 }
 0x234   : > { %p2484_p0 = pnand %p2483_p11, %p2477_p10 }
 0x236   : > { %2487 = shalt.err (!%p2484_p0)
}
 0x237   : > { %s2566_s28 = smov 128  }
 0x238   : > { %2349 = dma.vmem_to_hbm [thread:$0]  (%p3058_p9), %s2991_s4, 256, %s2997_s2, %s2196_s9, %s2566_s28, %s2566_s28, %s2550_s18  }
 0x239 PF: > { %s2226_s3 = sand.u32 1, %s2522_s6   ;;  %p3059_p6 = scmp.ne.s32.totalorder %s3055_s21, 0 }
 0x23a   : > { %p3060_p13 = scmp.ge.s32.totalorder %s2542_s11, 2  ;;  %s2227_s27 = scalar_lea.sflag [#allocation4], %s2226_s3 }
 0x23c   : > { %p2356_p2 = pnand %p3060_p13, %p3059_p6 }
 0x23e   : > { %2517 = dma.done.wait (!%p2356_p2), %s2227_s27, 256  }
 0x23f   : > { %2519 = vsyncadd (!%p2356_p2), %s2227_s27, 4294967040  ;;  %s17_s11 = sadd.s32 1, %s2542_s11   ;;  %s3061_s6 = smov %s2526_s7 }
 0x240   : > { %p14_p5 = scmp.ge.s32.totalorder %s17_s11, 4   ;;  %s3062_s7 = smov %s2530_s8 }
 0x241   : > { %s3063_s8 = smov %s2633_s20  ;;  %s3064_s9 = smov %s2538_s10 }
 0x242   : > { %s3065_s10 = smov %s3067_s14  ;;  %16 = sbr.rel (!%p14_p5) target bundleno = 6 (0x6), region = 69 }
 0x249   :  { %2232 = vsyncpa [#allocation3], 1 }
 0x24a   :  { %2234 = vsyncpa [#allocation3 + $0x1], 1 }
 0x24b   :  { %2235 = vsyncpa [#allocation4], 1 }
 0x24c   :  { %2237 = vsyncpa [#allocation4 + $0x1], 1 }

</bundles_post_ra>
